<compile_context>
chip_gen: v6e
topology: v6e:2x2x1
jax: 0.10.0
libtpu: 0.0.40
codegen_flags: <defaults>
</compile_context>

<pallas_src>
import numpy as np
import jax
import jax.numpy as jnp
from jax.experimental import pallas as pl
from jax.experimental.pallas import tpu as pltpu

_SCALE = 10.0 / np.log(10.0)             # 10 / ln(10)
_COEF = (65.481, 128.553, 24.966)        # RGB -> Y weights (module __init__)
_EPS = 1e-8
_LANES = 128
_ROW_ALIGN = 16                          # safe sublane packing for f32 and bf16


def _round_up(x, m):
    return (x + m - 1) // m * m


def _make_kernel_flat(inv_count: float):
    """Default path. pred/targ blocks: (1, tile_r, 128), all channels flattened."""

    def kernel(pred_ref, targ_ref, out_ref, acc_ref):
        s = pl.program_id(1)

        @pl.when(s == 0)
        def _init():
            acc_ref[...] = jnp.zeros_like(acc_ref)

        d = pred_ref[...].astype(jnp.float32) - targ_ref[...].astype(jnp.float32)
        sq = d * d                                        # (1, tile_r, 128)
        # Fold sublane-groups of 8 with pure VPU adds -> one (8,128) partial.
        acc_ref[...] += jnp.sum(sq.reshape(-1, 8, _LANES), axis=0)

        @pl.when(s == pl.num_programs(1) - 1)
        def _finalize():
            mse = jnp.sum(acc_ref[...], keepdims=True) * inv_count   # (1,1)
            logv = jnp.log(mse + _EPS)
            out_ref[...] = jnp.broadcast_to(logv[None], out_ref.shape)

    return kernel


def _make_kernel_toy(inv_count: float):
    """toY path. pred/targ blocks: (1, 3, tile_r, 128), channels kept for Y mix."""
    k0, k1, k2 = (float(c) / 255.0 for c in _COEF)        # python scalars only

    def kernel(pred_ref, targ_ref, out_ref, acc_ref):
        s = pl.program_id(1)

        @pl.when(s == 0)
        def _init():
            acc_ref[...] = jnp.zeros_like(acc_ref)

        d = pred_ref[...].astype(jnp.float32) - targ_ref[...].astype(jnp.float32)
        # Y(p) - Y(t): the +16 offsets cancel; only the channel mix remains.
        dy = d[:, 0] * k0 + d[:, 1] * k1 + d[:, 2] * k2   # (1, tile_r, 128)
        sq = dy * dy
        acc_ref[...] += jnp.sum(sq.reshape(-1, 8, _LANES), axis=0)

        @pl.when(s == pl.num_programs(1) - 1)
        def _finalize():
            mse = jnp.sum(acc_ref[...], keepdims=True) * inv_count   # (1,1)
            logv = jnp.log(mse + _EPS)
            out_ref[...] = jnp.broadcast_to(logv[None], out_ref.shape)

    return kernel


def psnr_loss(pred, target, loss_weight: float = 1.0, toY: bool = False,
              max_block_bytes: int = 2 * 1024 * 1024):
    """Pallas-TPU PSNR loss for NCHW inputs, reduction='mean'."""
    assert pred.ndim == 4, "expected 4-D NCHW input"
    assert pred.shape == target.shape
    B, C, H, W = pred.shape
    if toY:
        assert C == 3, "toY=True requires 3 input channels (RGB)"

    itemsize = jnp.dtype(pred.dtype).itemsize

    if toY:
        count = H * W                         # MSE is over the single Y channel
        rows0 = pl.cdiv(H * W, _LANES)
        bytes_per_row = 3 * _LANES * itemsize
    else:
        count = C * H * W
        rows0 = pl.cdiv(C * H * W, _LANES)
        bytes_per_row = _LANES * itemsize

    # Rows per block so one input block is <= max_block_bytes (and 16-aligned).
    cap = max(_ROW_ALIGN,
              (max_block_bytes // bytes_per_row) // _ROW_ALIGN * _ROW_ALIGN)
    tile_r = min(_round_up(rows0, _ROW_ALIGN), cap)
    rows = _round_up(rows0, tile_r)
    n_tiles = rows // tile_r

    def _prep(x):
        if toY:
            x = x.reshape(B, 3, H * W)
            padl = rows * _LANES - H * W
            if padl:
                x = jnp.pad(x, ((0, 0), (0, 0), (0, padl)))
            return x.reshape(B, 3, rows, _LANES)
        x = x.reshape(B, C * H * W)
        padl = rows * _LANES - C * H * W
        if padl:
            x = jnp.pad(x, ((0, 0), (0, padl)))
        return x.reshape(B, rows, _LANES)

    p = _prep(pred)
    t = _prep(target)

    if toY:
        kernel = _make_kernel_toy(1.0 / float(count))
        in_spec = pl.BlockSpec((1, 3, tile_r, _LANES), lambda b, s: (b, 0, s, 0))
    else:
        kernel = _make_kernel_flat(1.0 / float(count))
        in_spec = pl.BlockSpec((1, tile_r, _LANES), lambda b, s: (b, s, 0))

    out = pl.pallas_call(
        kernel,
        out_shape=jax.ShapeDtypeStruct((B, 8, _LANES), jnp.float32),
        grid=(B, n_tiles),
        in_specs=[in_spec, in_spec],
        out_specs=pl.BlockSpec((1, 8, _LANES), lambda b, s: (b, 0, 0)),
        scratch_shapes=[pltpu.VMEM((8, _LANES), jnp.float32)],
        compiler_params=pltpu.CompilerParams(
            # Batch axis is independent (shards across TCs); the row-tile axis
            # carries the running accumulator.
            dimension_semantics=("parallel", "arbitrary"),
        ),
    )(p, t)

    per_sample_log_mse = out[:, 0, 0]                      # (B,)
    return (float(loss_weight) * _SCALE) * jnp.mean(per_sample_log_mse)


def _psnr_loss_ref(pred, target, loss_weight=1.0, toY=False):
    """Pure-JAX reference mirroring the PyTorch forward, for validation."""
    pred = pred.astype(jnp.float32)
    target = target.astype(jnp.float32)
    if toY:
        coef = jnp.asarray(_COEF, jnp.float32).reshape(1, 3, 1, 1)
        pred = ((pred * coef).sum(axis=1, keepdims=True) + 16.0) / 255.0
        target = ((target * coef).sum(axis=1, keepdims=True) + 16.0) / 255.0
    mse = jnp.mean((pred - target) ** 2, axis=(1, 2, 3)) + 1e-8
    return loss_weight * _SCALE * jnp.mean(jnp.log(mse))


if __name__ == "__main__":
    key = jax.random.PRNGKey(0)
    k1, k2, k3, k4, k5, k6, k7, k8 = jax.random.split(key, 8)

    # 1) Default path, B=2, C=4, H=W=16.
    pred = jax.random.uniform(k1, (2, 4, 16, 16), dtype=jnp.float32)
    target = jax.random.uniform(k2, (2, 4, 16, 16), dtype=jnp.float32)
    got = jax.block_until_ready(psnr_loss(pred, target))
    want = _psnr_loss_ref(pred, target)
    np.testing.assert_allclose(np.asarray(got), np.asarray(want), rtol=1e-5, atol=1e-4)

    # 2) Multi-tile accumulator path: bigger image + tiny block cap.
    pred_b = jax.random.uniform(k3, (2, 4, 64, 64), dtype=jnp.float32)
    target_b = jax.random.uniform(k4, (2, 4, 64, 64), dtype=jnp.float32)
    got_mt = jax.block_until_ready(psnr_loss(pred_b, target_b, max_block_bytes=16 * 1024))
    want_mt = _psnr_loss_ref(pred_b, target_b)
    np.testing.assert_allclose(np.asarray(got_mt), np.asarray(want_mt), rtol=1e-5, atol=1e-4)

    # 3) toY path, B=2, C=3 (RGB), H=W=16.
    pred_y = jax.random.uniform(k5, (2, 3, 16, 16), dtype=jnp.float32)
    target_y = jax.random.uniform(k6, (2, 3, 16, 16), dtype=jnp.float32)
    got_y = jax.block_until_ready(psnr_loss(pred_y, target_y, toY=True))
    want_y = _psnr_loss_ref(pred_y, target_y, toY=True)
    np.testing.assert_allclose(np.asarray(got_y), np.asarray(want_y), rtol=1e-5, atol=1e-4)

    # 4) Spatial size not a multiple of 128 -> exercises the zero-pad path.
    pred_p = jax.random.uniform(k7, (2, 4, 10, 10), dtype=jnp.float32)
    target_p = jax.random.uniform(k8, (2, 4, 10, 10), dtype=jnp.float32)
    got_p = jax.block_until_ready(psnr_loss(pred_p, target_p, loss_weight=0.5))
    want_p = _psnr_loss_ref(pred_p, target_p, loss_weight=0.5)
    np.testing.assert_allclose(np.asarray(got_p), np.asarray(want_p), rtol=1e-5, atol=1e-4)

    # 5) bf16 inputs (narrow DMA, f32 math in-register).
    pred_h = pred.astype(jnp.bfloat16)
    target_h = target.astype(jnp.bfloat16)
    got_h = jax.block_until_ready(psnr_loss(pred_h, target_h))
    want_h = _psnr_loss_ref(pred_h, target_h)
    np.testing.assert_allclose(np.asarray(got_h), np.asarray(want_h), rtol=1e-4, atol=1e-3)

    print("KERNEL_OK")
</pallas_src>

<mosaic_0001>
module attributes {stable_mosaic.version = 11 : i64} {
  func.func @kernel(%arg0: i32, %arg1: i32, %arg2: memref<1x16x128xf32, #tpu.memory_space<vmem>>, %arg3: memref<1x16x128xf32, #tpu.memory_space<vmem>>, %arg4: memref<1x8x128xf32, #tpu.memory_space<vmem>>, %arg5: memref<8x128xf32, #tpu.memory_space<vmem>>) attributes {dimension_semantics = [#tpu.dimension_semantics<parallel>, #tpu.dimension_semantics<arbitrary>], iteration_bounds = array<i64: 2, 1>, scalar_prefetch = 0 : i64, scratch_operands = 1 : i64, tpu.core_type = #tpu.core_type<tc>, window_params = [{transform_indices = @transform_0, window_bounds = array<i64: 1, 16, 128>}, {transform_indices = @transform_1, window_bounds = array<i64: 1, 16, 128>}, {transform_indices = @transform_2, window_bounds = array<i64: 1, 8, 128>}]} {
    %c0_i32 = arith.constant 0 : i32
    %0 = arith.cmpi eq, %arg1, %c0_i32 : i32
    %1 = arith.extui %0 : i1 to i32
    %c0_i32_0 = arith.constant 0 : i32
    %2 = arith.cmpi ne, %1, %c0_i32_0 : i32
    scf.if %2 {
      %cst_12 = arith.constant 0.000000e+00 : f32
      %15 = vector.broadcast %cst_12 : f32 to vector<8x128xf32>
      %c0_13 = arith.constant 0 : index
      %c0_14 = arith.constant 0 : index
      %16 = vector.load %arg5[%c0_13, %c0_14] : memref<8x128xf32, #tpu.memory_space<vmem>>, vector<8x128xf32>
      tpu.vector_store %arg5[%c0_13, %c0_14], %15 {strides = array<i32>} : memref<8x128xf32, #tpu.memory_space<vmem>>, vector<8x128xf32>,
    } else {
    }
    %c0 = arith.constant 0 : index
    %c0_1 = arith.constant 0 : index
    %c0_2 = arith.constant 0 : index
    %3 = vector.load %arg2[%c0, %c0_1, %c0_2] : memref<1x16x128xf32, #tpu.memory_space<vmem>>, vector<1x16x128xf32>
    %c0_3 = arith.constant 0 : index
    %c0_4 = arith.constant 0 : index
    %c0_5 = arith.constant 0 : index
    %4 = vector.load %arg3[%c0_3, %c0_4, %c0_5] : memref<1x16x128xf32, #tpu.memory_space<vmem>>, vector<1x16x128xf32>
    %5 = arith.subf %3, %4 : vector<1x16x128xf32>
    %6 = arith.mulf %5, %5 : vector<1x16x128xf32>
    %c0_6 = arith.constant 0 : index
    %c0_7 = arith.constant 0 : index
    %7 = vector.load %arg5[%c0_6, %c0_7] : memref<8x128xf32, #tpu.memory_space<vmem>>, vector<8x128xf32>
    %8 = vector.shape_cast %6 : vector<1x16x128xf32> to vector<2x8x128xf32>
    %cst = arith.constant dense<0.000000e+00> : vector<8x128xf32>
    %9 = vector.multi_reduction <add>, %8, %cst [0] : vector<2x8x128xf32> to vector<8x128xf32>
    %10 = arith.addf %7, %9 : vector<8x128xf32>
    %c0_8 = arith.constant 0 : index
    %c0_9 = arith.constant 0 : index
    %11 = vector.load %arg5[%c0_8, %c0_9] : memref<8x128xf32, #tpu.memory_space<vmem>>, vector<8x128xf32>
    tpu.vector_store %arg5[%c0_8, %c0_9], %10 {strides = array<i32>} : memref<8x128xf32, #tpu.memory_space<vmem>>, vector<8x128xf32>,
    %c0_i32_10 = arith.constant 0 : i32
    %12 = arith.cmpi eq, %arg1, %c0_i32_10 : i32
    %13 = arith.extui %12 : i1 to i32
    %c0_i32_11 = arith.constant 0 : i32
    %14 = arith.cmpi ne, %13, %c0_i32_11 : i32
    scf.if %14 {
      %c0_12 = arith.constant 0 : index
      %c0_13 = arith.constant 0 : index
      %15 = vector.load %arg5[%c0_12, %c0_13] : memref<8x128xf32, #tpu.memory_space<vmem>>, vector<8x128xf32>
      %16 = vector.shape_cast %15 : vector<8x128xf32> to vector<1x8x128xf32>
      %cst_14 = arith.constant dense<0.000000e+00> : vector<1xf32>
      %17 = vector.multi_reduction <add>, %16, %cst_14 [1, 2] : vector<1x8x128xf32> to vector<1xf32>
      %18 = vector.shape_cast %17 : vector<1xf32> to vector<1x1x1xf32>
      %19 = vector.extract %18[0, 0, 0] : f32 from vector<1x1x1xf32>
      %20 = vector.broadcast %19 : f32 to vector<1x1xf32>
      %cst_15 = arith.constant 9.765625E-4 : f32
      %21 = vector.broadcast %cst_15 : f32 to vector<1x1xf32>
      %22 = arith.mulf %20, %21 : vector<1x1xf32>
      %cst_16 = arith.constant 9.99999993E-9 : f32
      %23 = vector.broadcast %cst_16 : f32 to vector<1x1xf32>
      %24 = arith.addf %22, %23 : vector<1x1xf32>
      %25 = math.log %24 : vector<1x1xf32>
      %26 = vector.shape_cast %25 : vector<1x1xf32> to vector<1x1x1xf32>
      %27 = vector.shape_cast %26 : vector<1x1x1xf32> to vector<1x1x1xf32>
      %28 = vector.broadcast %27 : vector<1x1x1xf32> to vector<1x8x128xf32>
      %c0_17 = arith.constant 0 : index
      %c0_18 = arith.constant 0 : index
      %c0_19 = arith.constant 0 : index
      %29 = vector.load %arg4[%c0_17, %c0_18, %c0_19] : memref<1x8x128xf32, #tpu.memory_space<vmem>>, vector<1x8x128xf32>
      tpu.vector_store %arg4[%c0_17, %c0_18, %c0_19], %28 {strides = array<i32>} : memref<1x8x128xf32, #tpu.memory_space<vmem>>, vector<1x8x128xf32>,
    } else {
    }
    return
  }
  func.func @transform_0(%arg0: i32, %arg1: i32) -> (i32, i32, i32) {
    %c0_i32 = arith.constant 0 : i32
    %c0_i32_0 = arith.constant 0 : i32
    return %arg0, %arg1, %c0_i32 : i32, i32, i32
  }
  func.func @transform_1(%arg0: i32, %arg1: i32) -> (i32, i32, i32) {
    %c0_i32 = arith.constant 0 : i32
    %c0_i32_0 = arith.constant 0 : i32
    return %arg0, %arg1, %c0_i32 : i32, i32, i32
  }
  func.func @transform_2(%arg0: i32, %arg1: i32) -> (i32, i32, i32) {
    %c0_i32 = arith.constant 0 : i32
    %c0_i32_0 = arith.constant 0 : i32
    %c0_i32_1 = arith.constant 0 : i32
    return %arg0, %c0_i32, %c0_i32_0 : i32, i32, i32
  }
}

</mosaic_0001>

<bundles_post_ra>
// kernel: tpu_custom_call.1
= control target key start
LH: loop header
LB: loop body
LE: loop exit
PB: predicated region body
PF: predicated region fallthrough
CT: control target
= control target key end

     0   :  { %7 = vsyncpa [#allocation4], 0  ;;  %s804_s0 = inlined_call_operand.hbm [shape: f32[2,16,128], index: 0, kind: input, shape index: {}]   ;;  %s805_s1 = inlined_call_operand.hbm [shape: f32[2,16,128], index: 1, kind: input, shape index: {}]   ;;  %s806_s2 = inlined_call_operand.hbm [shape: f32[2,8,128], index: 2, kind: output, shape index: {}]  }
   0x1   :  { %9 = vsyncpa [#allocation4 + $0x1], 0 }
   0x2   :  { %10 = vsyncpa [#allocation7], 0 }
   0x3   :  { %12 = vsyncpa [#allocation7 + $0x1], 0 }
   0x4   :  { %13 = vsyncpa [#allocation5], 0 }
   0x5   :  { %15 = vsyncpa [#allocation5 + $0x1], 0  ;;  %s636_s9 = smov 0   ;;  %s638_s10 = smov 0  }
   0x6   :  { %s640_s11 = smov 0   ;;  %s642_s12 = smov 0  }
   0x7   :  { %s644_s13 = smov 0   ;;  %s646_s14 = smov 0  }
   0x8 LB: > { %s381_s15 = sadd.s32 4294967295, %s614_s14   ;;  %s382_s16 = sadd.s32 4294967294, %s614_s14   ;;  %s614_s14 = sphi %s646_s14, %s21_s14   ;;  %s610_s13 = sphi %s644_s13, %s818_s13   ;;  %s606_s12 = sphi %s642_s12, %s817_s12   ;;  %s602_s11 = sphi %s640_s11, %s816_s11   ;;  %s598_s10 = sphi %s638_s10, %s815_s10   ;;  %s594_s9 = sphi %s636_s9, %s814_s9  }
   0x9   : > { %s33_s17 = sadd.s32 1, %s610_s13  ;;  %s42_s18 = sadd.s32 1, %s602_s11 }
   0xa   : > { %p35_p0 = scmp.ge.s32.totalorder %s33_s17, 2  ;;  %p49_p1 = scmp.ne.s32.totalorder %s602_s11, %s598_s10 }
   0xb   : > { %p50_p2 = scmp.eq.s32.totalorder %s614_s14, 0  ;;  %p55_p3 = scmp.ne.s32.totalorder %s598_s10, %s594_s9 }
   0xc   : > { %s820_s17 = smov (%p35_p0, %s33_s17), 0  ;;  %p56_p5 = scmp.eq.s32.totalorder %s381_s15, 0 }
   0xd   : > { %p677_p4 = por %p50_p2, %p49_p1  ;;  %s37_s20 = ssub.s32 %s610_s13, %s820_s17 }
   0xe   : > { %p107_p6 = scmp.eq.s32.totalorder %s381_s15, 1  ;;  %p40_p7 = scmp.eq.s32.totalorder %s37_s20, 0 }
   0xf   : > { %p683_p8 = por %p56_p5, %p55_p3  ;;  %p113_p10 = scmp.eq.s32.totalorder %s382_s16, 1 }
  0x10   : > { %p687_p9 = por %p107_p6, %p49_p1  ;;  %p420_p13 = scmp.lt.s32.totalorder %s614_s14, 2 }
  0x11   : > { %s692_s23 = scalar_select %p40_p7, %s602_s11, %s42_s18  }
  0x12   : > { %p694_p11 = por %p113_p10, %p55_p3  ;;  %s701_s25 = sand.u32 1, %s602_s11  }
  0x13   : > { %s385_s26 = sshll.u32 %s701_s25, 4  ;;  %s399_s27 = sshll.u32 %s610_s13, 8 }
  0x14   : > { %s145_s30 = scalar_lea.hbm %s804_s0, %s399_s27  ;;  %s137_s3 = scalar_lea.vmem [#allocation3], %s385_s26 }
  0x15   : > { %s146_s4 = sshll.u32 %s137_s3, 4  ;;  %p714_p0 = pnand %p420_p13, %p677_p4  ;;  %s147_s4 = int_to_ptr.vmem [resolvable:$true] %s146_s4 }
  0x16   : > { %p391_p1 = scmp.ge.s32.totalorder %s614_s14, 1  ;;  %s134_s6 = scalar_lea.sflag [#allocation4], %s701_s25 }
  0x17   : > { %p476_p2 = pneg %p714_p0  ;;  %s487_s7 = scalar_lea.vmem %s147_s4, 256 }
  0x18   : > { %p488_p3 = scmp.ne.s32.totalorder %s147_s4, %s487_s7  ;;  %s616_s8 = smov [#allocation3]  }
  0x19   : > { %s492_s15 = sshll.u32 %s616_s8, 4  ;;  %s493_s15 = int_to_ptr.vmem [resolvable:$false] %s492_s15 }
  0x1a   : > { %p490_p5 = pnand %p488_p3, %p476_p2  ;;  %s494_s16 = scalar_lea.vmem %s493_s15, 512 }
  0x1b   : > { %p495_p4 = scmp.lt.s32.totalorder %s147_s4, %s493_s15  ;;  %p496_p7 = scmp.lt.s32.totalorder %s494_s16, %s487_s7 }
  0x1c   : > { %p491_p6 = pneg %p490_p5 }
  0x1d   : > { %p497_p10 = por %p496_p7, %p495_p4 }
  0x1f   : > { %p498_p13 = pnand %p497_p10, %p491_p6 }
  0x21   : > { %501 = shalt.err (!%p498_p13)
}
  0x22   : > { %s617_s18 = smov 128   ;;  %s618_s19 = smov 8  }
  0x23   : > { %412 = dma.hbm_to_vmem [thread:$0]  (!%p714_p0), %s145_s30, 256, %s147_s4, %s134_s6, %s617_s18, %s617_s18, %s618_s19  }
  0x24   : > { %p177_p3 = scmp.lt.s32.totalorder %s614_s14, 3  ;;  %s168_s29 = scalar_lea.hbm %s805_s1, %s399_s27 }
  0x25   : > { %s160_s7 = scalar_lea.vmem [#allocation6], %s385_s26  ;;  %s157_s15 = scalar_lea.sflag [#allocation7], %s701_s25 }
  0x26   : > { %p735_p5 = pnand %p391_p1, %p177_p3  ;;  %s169_s8 = sshll.u32 %s160_s7, 4  ;;  %s170_s8 = int_to_ptr.vmem [resolvable:$true] %s169_s8 }
  0x27   : > { %s515_s16 = scalar_lea.vmem %s170_s8, 256  ;;  %s619_s30 = smov [#allocation6]  }
  0x28   : > { %p516_p6 = scmp.ne.s32.totalorder %s170_s8, %s515_s16  ;;  %s520_s4 = sshll.u32 %s619_s30, 4  ;;  %s521_s4 = int_to_ptr.vmem [resolvable:$false] %s520_s4 }
  0x29   : > { %s522_s27 = scalar_lea.vmem %s521_s4, 512  ;;  %p523_p10 = scmp.lt.s32.totalorder %s170_s8, %s521_s4 }
  0x2a   : > { %p518_p4 = pnand %p516_p6, %p476_p2  ;;  %p524_p1 = scmp.lt.s32.totalorder %s522_s27, %s515_s16 }
  0x2c   : > { %p519_p7 = pneg %p518_p4  ;;  %p525_p13 = por %p524_p1, %p523_p10 }
  0x2e   : > { %p526_p3 = pnand %p525_p13, %p519_p7 }
  0x30   : > { %529 = shalt.err (!%p526_p3)
}
  0x31   : > { %415 = dma.hbm_to_vmem [thread:$0]  (!%p714_p0), %s168_s29, 256, %s170_s8, %s157_s15, %s617_s18, %s617_s18, %s618_s19  }
  0x32   : > { %181 = sbr.rel (%p735_p5) target bundleno = 300 (0x12c), region = 28  ;;  %s750_s25 = sand.u32 (!%p735_p5), 1, %s598_s10  }
  0x33   : > { %s392_s26 = sshll.u32 (!%p735_p5), %s750_s25, 4  ;;  %s184_s6 = scalar_lea.sflag (!%p735_p5), [#allocation4], %s750_s25 }
  0x34   : > { %s187_s20 = scalar_lea.vmem (!%p735_p5), [#allocation3], %s392_s26 }
  0x37   : > { %581 = dma.done.wait (%p683_p8), %s184_s6, 256  }
  0x38   : > { %583 = vsyncadd (%p683_p8), %s184_s6, 4294967040  ;;  %s193_s5 = scalar_lea.sflag [#allocation7], %s750_s25  ;;  %s196_s18 = scalar_lea.vmem [#allocation6], %s392_s26 }
  0x39   : > { %585 = dma.done.wait (%p683_p8), %s193_s5, 256  }
  0x3a   : > { %587 = vsyncadd (%p683_p8), %s193_s5, 4294967040  ;;  %v229_v0 = vld [vmem:[%s187_s20] sm:$0xff]  ;;  %v230_v1 = vld [vmem:[%s187_s20 + $0x8] sm:$0xff]  ;;  %s394_s19 = sshll.u32 %s750_s25, 3  ;;  %s396_s28 = sshll.u32 %s606_s12, 7 }
  0x3b   : > { %v231_v2 = vld [vmem:[%s196_s18] sm:$0xff]  ;;  %v232_v3 = vld [vmem:[%s196_s18 + $0x8] sm:$0xff]  ;;  %s221_s29 = scalar_lea.vmem [#allocation8], %s394_s19  ;;  %s272_s15 = scalar_lea.hbm %s806_s2, %s396_s28 }
  0x3c   : > { %v233_v4 = vsub.f32 %v229_v0, %v231_v2  ;;  %v234_v5 = vsub.f32 %v230_v1, %v232_v3  ;;  %s274_s3 = sshll.u32 %s221_s29, 4  ;;  %s261_s16 = scalar_lea.sflag [#allocation5], %s750_s25  ;;  %s275_s3 = int_to_ptr.vmem [resolvable:$true] %s274_s3 }
  0x3d   : > { %s530_s30 = scalar_lea.vmem %s275_s3, 128  ;;  %s620_s4 = smov [#allocation8]  }
  0x3e   : > { %v235_v6 = vmul.f32 %v233_v4, %v233_v4  ;;  %v236_v7 = vmul.f32 %v234_v5, %v234_v5  ;;  %p531_p8 = scmp.ne.s32.totalorder %s275_s3, %s530_s30  ;;  %s534_s27 = sshll.u32 %s620_s4, 4  ;;  %s535_s27 = int_to_ptr.vmem [resolvable:$false] %s534_s27 }
  0x3f   : > { %s536_s12 = scalar_lea.vmem %s535_s27, 256  ;;  %p537_p5 = scmp.lt.s32.totalorder %s275_s3, %s535_s27 }
  0x40   : > { %v238_v8 = vadd.f32 %v236_v7, %v235_v6  ;;  %p532_p0 = pnand %p531_p8, %p687_p9  ;;  %p538_p6 = scmp.lt.s32.totalorder %s536_s12, %s530_s30 }
  0x42   : > { %245 = vadd.xlane.f32.xlu0 %v238_v8  ;;  %p533_p2 = pneg %p532_p0  ;;  %p539_p4 = por %p538_p6, %p537_p5 }
  0x44   : > { %p540_p7 = pnand %p539_p4, %p533_p2 }
  0xcb   : > { %v246_v9 = vpop.xlane.xlu0 %245 }
  0xcc   : > { %v247_v10 = vrot.slane %v246_v9, 4 }
  0xce   : > { %v248_v11 = vadd.f32 %v247_v10, %v246_v9 }
  0xd0   : > { %v249_v12 = vrot.slane %v248_v11, 2 }
  0xd2   : > { %v250_v13 = vadd.f32 %v249_v12, %v248_v11 }
  0xd4   : > { %v251_v14 = vrot.slane %v250_v13, 1 }
  0xd6   : > { %v252_v15 = vadd.f32 %v251_v14, %v250_v13 }
  0xd8   : > { %401 = vpush %v252_v15 }
 0x109   : > { %s402_s21 = spop %401 }
 0x10a   : > { %v254_v16 = vstv %s402_s21 }
 0x10b   : > { %v255_v17 = vmul.f32 0.0009765625, %v254_v16 }
 0x10d   : > { %v256_v18 = vadd.f32 1e-08, %v255_v17 }
 0x10f   : > { %472 = vlog2.f32 %v256_v18 }
 0x11c   : > { %v473_v19 = vpop.eup %472 }
 0x11d   : > { %v258_v20 = vmul.f32 0.6931472, %v473_v19 }
 0x11f   : > { %259 = vst [vmem:[%s221_s29] sm:$0xff] %v258_v20 }
 0x120   : > { %543 = shalt.err (!%p540_p7)
}
 0x121   : > { %s544_s26 = scalar_lea.hbm %s272_s15, 128  ;;  %s548_s20 = scalar_lea.hbm %s806_s2, 256 }
 0x122   : > { %p545_p10 = scmp.ne.s32.totalorder %s272_s15, %s544_s26  ;;  %p549_p3 = scmp.lt.s32.totalorder %s272_s15, %s806_s2 }
 0x123   : > { %p550_p8 = scmp.lt.s32.totalorder %s548_s20, %s544_s26 }
 0x124   : > { %p546_p1 = pnand %p545_p10, %p687_p9 }
 0x125   : > { %p551_p0 = por %p550_p8, %p549_p3 }
 0x126   : > { %p547_p13 = pneg %p546_p1 }
 0x128   : > { %p552_p12 = pnand %p551_p0, %p547_p13 }
 0x12a   : > { %555 = shalt.err (!%p552_p12)
}
 0x12b   : > { %407 = dma.vmem_to_hbm [thread:$0]  (%p687_p9), %s275_s3, 128, %s272_s15, %s261_s16  }
 0x12c PF: > { %s286_s21 = sand.u32 1, %s594_s9   ;;  %p813_p2 = scmp.ge.s32.totalorder %s614_s14, 2 }
 0x12d   : > { %s287_s19 = scalar_lea.sflag [#allocation5], %s286_s21 }
 0x12e   : > { %p417_p5 = pnand %p813_p2, %p694_p11 }
 0x130   : > { %p418_p6 = pneg %p417_p5 }
 0x132   : > { %589 = dma.done.wait (%p418_p6), %s287_s19, 128  }
 0x133   : > { %591 = vsyncadd (%p418_p6), %s287_s19, 4294967168  ;;  %s21_s14 = sadd.s32 1, %s614_s14   ;;  %s814_s9 = smov %s598_s10 }
 0x134   : > { %p18_p4 = scmp.ge.s32.totalorder %s21_s14, 4   ;;  %s815_s10 = smov %s602_s11 }
 0x135   : > { %s816_s11 = smov %s692_s23  ;;  %s817_s12 = smov %s610_s13 }
 0x136   : > { %s818_s13 = smov %s820_s17  ;;  %20 = sbr.rel (!%p18_p4) target bundleno = 8 (0x8), region = 94 }
 0x13b   :  { %292 = vsyncpa [#allocation4], 1 }
 0x13c   :  { %294 = vsyncpa [#allocation4 + $0x1], 1 }
 0x13d   :  { %295 = vsyncpa [#allocation7], 1 }
 0x13e   :  { %297 = vsyncpa [#allocation7 + $0x1], 1 }
 0x13f   :  { %298 = vsyncpa [#allocation5], 1 }
 0x140   :  { %300 = vsyncpa [#allocation5 + $0x1], 1 }

</bundles_post_ra>
